<compile_context>
chip_gen: v7x
topology: tpu7x:2x2x1
jax: 0.10.0
libtpu: 0.0.40
codegen_flags: <defaults>
</compile_context>

<pallas_src>
from functools import partial

import jax
import jax.numpy as jnp
from jax.experimental import pallas as pl
from jax.experimental.pallas import tpu as pltpu

_LANE = 128
_SINGLE_BLOCK_MAX_B = 2048   # below this, one full-batch block (no pipelining)


def _round_up(x: int, m: int) -> int:
    return ((x + m - 1) // m) * m


# ----------------------------------------------------------------------------
# Pallas kernel: fused (cast ->) Linear -> ReLU -> Linear on one batch tile
# ----------------------------------------------------------------------------
def _mlp_kernel(x_ref, w1_ref, b1_ref, w2_ref, b2_ref, o_ref):
    # int -> f32 cast fused into the kernel (no separate XLA op / HBM pass).
    x = x_ref[...].astype(jnp.float32)
    h = jnp.dot(x, w1_ref[...], preferred_element_type=jnp.float32) + b1_ref[...]
    h = jnp.maximum(h, 0.0)                                   # ReLU on the VPU
    o_ref[...] = (
        jnp.dot(h, w2_ref[...], preferred_element_type=jnp.float32) + b2_ref[...]
    )


@partial(jax.jit, static_argnames=("out_shape",))
def _mlp_forward(x, w1, b1, w2, b2, *, out_shape):
    """Full post-processor path inside ONE jit: reshape, Pallas MLP, slice,
    reshape-back.  x: raw (possibly int) tensor, any shape whose squeezed form
    is [..., F].  Padded weights: w1 [F,Hp], b1 [1,Hp], w2 [Hp,Rp], b2 [1,Rp]
    with Hp, Rp multiples of 128.  out_shape: static final output shape."""
    rep_dim = out_shape[-1]
    F = w1.shape[0]
    Hp = w1.shape[1]
    Rp = w2.shape[1]

    B = x.size // F                      # fold all leading (and size-1) dims
    x2d = x.reshape(B, F)

    if B <= _SINGLE_BLOCK_MAX_B:
        # Single full-batch block: block shape == full array dims (always a
        # legal tiling), grid of one step, zero pipelining overhead.
        tile_b, Bp = B, B
    else:
        # Large batch: big tiles only.  Pad B up to a tile multiple so awkward
        # batch sizes never degrade to tiny tiles / huge grids.
        tile_b = 1024 if (B % 1024 == 0) else 512
        Bp = _round_up(B, tile_b)
        if Bp != B:
            x2d = jnp.pad(x2d, ((0, Bp - B), (0, 0)))

    grid = (Bp // tile_b,)

    rep_pad = pl.pallas_call(
        _mlp_kernel,
        out_shape=jax.ShapeDtypeStruct((Bp, Rp), jnp.float32),
        grid=grid,
        in_specs=[
            pl.BlockSpec((tile_b, F), lambda i: (i, 0)),   # x tile (pipelined)
            pl.BlockSpec((F, Hp), lambda i: (0, 0)),       # weights: VMEM-resident
            pl.BlockSpec((1, Hp), lambda i: (0, 0)),
            pl.BlockSpec((Hp, Rp), lambda i: (0, 0)),
            pl.BlockSpec((1, Rp), lambda i: (0, 0)),
        ],
        out_specs=pl.BlockSpec((tile_b, Rp), lambda i: (i, 0)),  # lane-dense store
        compiler_params=pltpu.CompilerParams(
            dimension_semantics=("parallel",)),
    )(x2d, w1, b1, w2, b2)

    # Slice off padded batch rows + padded rep columns and restore the
    # squeezed output shape -- all fused inside this jit (no extra dispatch).
    return rep_pad[:B, :rep_dim].reshape(out_shape)


# ----------------------------------------------------------------------------
# Parameters / module
# ----------------------------------------------------------------------------
class MLPParams:
    """Linear(in, hidden) -> ReLU -> Linear(hidden, rep_dim).

    Keeps torch-shaped (un-padded) weights for the reference and zero-padded,
    lane-dense (multiple-of-128 hidden/rep) copies for the Pallas kernel."""

    def __init__(self, in_dim: int, hidden_dim: int, rep_dim: int, key):
        k1, k2, k3, k4 = jax.random.split(key, 4)
        self.in_dim, self.hidden_dim, self.rep_dim = in_dim, hidden_dim, rep_dim

        self.w1 = jax.random.normal(k1, (in_dim, hidden_dim), jnp.float32) * (2.0 / in_dim) ** 0.5
        self.b1 = jax.random.normal(k2, (hidden_dim,), jnp.float32) * 0.01
        self.w2 = jax.random.normal(k3, (hidden_dim, rep_dim), jnp.float32) * (2.0 / hidden_dim) ** 0.5
        self.b2 = jax.random.normal(k4, (rep_dim,), jnp.float32) * 0.01

        hp = _round_up(hidden_dim, _LANE)
        rp = _round_up(rep_dim, _LANE)
        self.w1_p = jnp.zeros((in_dim, hp), jnp.float32).at[:, :hidden_dim].set(self.w1)
        self.b1_p = jnp.zeros((1, hp), jnp.float32).at[0, :hidden_dim].set(self.b1)
        self.w2_p = jnp.zeros((hp, rp), jnp.float32).at[:hidden_dim, :rep_dim].set(self.w2)
        self.b2_p = jnp.zeros((1, rp), jnp.float32).at[0, :rep_dim].set(self.b2)

        self.kwargs_for_loading = dict(in_dim=in_dim, hidden_dim=hidden_dim, rep_dim=rep_dim)


class AblationEncoder:
    def __init__(self, rep_dim: int, post_processor: MLPParams = None):
        self.rep_dim = rep_dim
        self.post_processor = post_processor
        self.kwargs_for_loading = {"rep_dim": rep_dim}
        if post_processor is not None:
            self.kwargs_for_loading = {
                **self.kwargs_for_loading,
                "post_processor_kwargs": post_processor.kwargs_for_loading,
            }

    def __call__(self, gt_factor_classes: jnp.ndarray) -> dict:
        # torch .squeeze(): drop every size-1 dim.
        squeezed = tuple(d for d in gt_factor_classes.shape if d != 1)

        if self.post_processor is None:
            # No compute here: plain cast + reshape (XLA handles this for free).
            return {"rep": gt_factor_classes.astype(jnp.float32).reshape(squeezed)}

        p = self.post_processor
        if len(squeezed) == 0 or squeezed[-1] != p.in_dim:
            raise ValueError(
                f"AblationEncoder: squeezed input shape {squeezed} is not "
                f"compatible with post_processor in_dim={p.in_dim}")

        out_shape = squeezed[:-1] + (p.rep_dim,)
        rep = _mlp_forward(gt_factor_classes, p.w1_p, p.b1_p, p.w2_p, p.b2_p,
                           out_shape=out_shape)
        return {"rep": rep}


# ----------------------------------------------------------------------------
# Pure-JAX reference (torch-equivalent) for correctness checks
# ----------------------------------------------------------------------------
def _ref_forward(encoder: AblationEncoder, gt_factor_classes):
    x = gt_factor_classes.astype(jnp.float32)
    x = x.reshape(tuple(d for d in x.shape if d != 1))
    if encoder.post_processor is not None:
        p = encoder.post_processor
        h = jnp.maximum(x @ p.w1 + p.b1, 0.0)
        return {"rep": h @ p.w2 + p.b2}
    return {"rep": x}


# ----------------------------------------------------------------------------
# main
# ----------------------------------------------------------------------------
if __name__ == "__main__":
    key = jax.random.PRNGKey(0)
    k_params, k_data = jax.random.split(key)

    n_factors, hidden, rep_dim = 8, 32, 16
    post_processor = MLPParams(n_factors, hidden, rep_dim, k_params)
    enc = AblationEncoder(rep_dim=rep_dim, post_processor=post_processor)

    # Path 1: MLP post_processor, small batch -> single full-batch block.
    B = 256
    gt = jax.random.randint(k_data, (B, n_factors, 1, 1), minval=0, maxval=10, dtype=jnp.int32)
    rep = jax.block_until_ready(enc(gt)["rep"])
    ref = _ref_forward(enc, gt)["rep"]
    assert rep.shape == (B, rep_dim) and rep.dtype == jnp.float32
    assert jnp.allclose(rep, ref, atol=1e-5, rtol=1e-5)

    # Path 1b: B == 1 squeeze edge case (torch output is 1-D [rep_dim]).
    gt1 = jax.random.randint(k_data, (1, n_factors, 1, 1), minval=0, maxval=10, dtype=jnp.int32)
    rep1 = jax.block_until_ready(enc(gt1)["rep"])
    ref1 = _ref_forward(enc, gt1)["rep"]
    assert rep1.shape == (rep_dim,)
    assert jnp.allclose(rep1, ref1, atol=1e-5, rtol=1e-5)

    # Path 1c: large batch -> multi-block grid (512-row tiles, grid=(5,)).
    Bbig = 2560
    gt_big = jax.random.randint(k_data, (Bbig, n_factors, 1, 1), minval=0, maxval=10, dtype=jnp.int32)
    rep_big = jax.block_until_ready(enc(gt_big)["rep"])
    ref_big = _ref_forward(enc, gt_big)["rep"]
    assert rep_big.shape == (Bbig, rep_dim)
    assert jnp.allclose(rep_big, ref_big, atol=1e-5, rtol=1e-5)

    # Path 1d: awkward large batch -> zero-row padding to a tile multiple.
    Bodd = 2100
    gt_odd = jax.random.randint(k_data, (Bodd, n_factors, 1, 1), minval=0, maxval=10, dtype=jnp.int32)
    rep_odd = jax.block_until_ready(enc(gt_odd)["rep"])
    ref_odd = _ref_forward(enc, gt_odd)["rep"]
    assert rep_odd.shape == (Bodd, rep_dim)
    assert jnp.allclose(rep_odd, ref_odd, atol=1e-5, rtol=1e-5)

    # Path 2: no post_processor (cast + squeeze only; no Pallas kernel needed).
    enc_id = AblationEncoder(rep_dim=rep_dim, post_processor=None)
    gt_small = jax.random.randint(k_data, (4, n_factors, 1, 1), minval=0, maxval=10, dtype=jnp.int32)
    rep_id = jax.block_until_ready(enc_id(gt_small)["rep"])
    ref_id = _ref_forward(enc_id, gt_small)["rep"]
    assert rep_id.shape == (4, n_factors) and rep_id.dtype == jnp.float32
    assert jnp.allclose(rep_id, ref_id)

    print("KERNEL_OK")
</pallas_src>

<mosaic_0001>
module attributes {stable_mosaic.version = 11 : i64} {
  func.func @_mlp_kernel(%arg0: i32, %arg1: memref<256x8xi32, #tpu.memory_space<vmem>>, %arg2: memref<8x128xf32, #tpu.memory_space<vmem>>, %arg3: memref<1x128xf32, #tpu.memory_space<vmem>>, %arg4: memref<128x128xf32, #tpu.memory_space<vmem>>, %arg5: memref<1x128xf32, #tpu.memory_space<vmem>>, %arg6: memref<256x128xf32, #tpu.memory_space<vmem>>) attributes {dimension_semantics = [#tpu.dimension_semantics<parallel>], iteration_bounds = array<i64: 1>, scalar_prefetch = 0 : i64, scratch_operands = 0 : i64, tpu.core_type = #tpu.core_type<tc>, window_params = [{transform_indices = @transform_0, window_bounds = array<i64: 256, 8>}, {pipeline_mode = #tpu.pipeline_mode<synchronous>, transform_indices = @transform_1, window_bounds = array<i64: 8, 128>}, {pipeline_mode = #tpu.pipeline_mode<synchronous>, transform_indices = @transform_2, window_bounds = array<i64: 1, 128>}, {pipeline_mode = #tpu.pipeline_mode<synchronous>, transform_indices = @transform_3, window_bounds = array<i64: 128, 128>}, {pipeline_mode = #tpu.pipeline_mode<synchronous>, transform_indices = @transform_4, window_bounds = array<i64: 1, 128>}, {transform_indices = @transform_5, window_bounds = array<i64: 256, 128>}]} {
    %c0 = arith.constant 0 : index
    %c0_0 = arith.constant 0 : index
    %0 = vector.load %arg1[%c0, %c0_0] : memref<256x8xi32, #tpu.memory_space<vmem>>, vector<256x8xi32>
    %1 = arith.sitofp %0 : vector<256x8xi32> to vector<256x8xf32>
    %c0_1 = arith.constant 0 : index
    %c0_2 = arith.constant 0 : index
    %2 = vector.load %arg2[%c0_1, %c0_2] : memref<8x128xf32, #tpu.memory_space<vmem>>, vector<8x128xf32>
    %cst = arith.constant dense<0.000000e+00> : vector<256x128xf32>
    %3 = tpu.matmul %1, %2, %cst {dimension_numbers = #tpu.dot_dimension_numbers<[1], [0], [0], [1], [0, 0, 1, 1], [], []>} : vector<256x8xf32>, vector<8x128xf32>, vector<256x128xf32> -> vector<256x128xf32>
    %c0_3 = arith.constant 0 : index
    %c0_4 = arith.constant 0 : index
    %4 = vector.load %arg3[%c0_3, %c0_4] : memref<1x128xf32, #tpu.memory_space<vmem>>, vector<1x128xf32>
    %5 = vector.broadcast %4 : vector<1x128xf32> to vector<256x128xf32>
    %6 = arith.addf %3, %5 : vector<256x128xf32>
    %cst_5 = arith.constant 0.000000e+00 : f32
    %7 = vector.broadcast %cst_5 : f32 to vector<256x128xf32>
    %8 = arith.maximumf %6, %7 : vector<256x128xf32>
    %c0_6 = arith.constant 0 : index
    %c0_7 = arith.constant 0 : index
    %9 = vector.load %arg4[%c0_6, %c0_7] : memref<128x128xf32, #tpu.memory_space<vmem>>, vector<128x128xf32>
    %cst_8 = arith.constant dense<0.000000e+00> : vector<256x128xf32>
    %10 = tpu.matmul %8, %9, %cst_8 {dimension_numbers = #tpu.dot_dimension_numbers<[1], [0], [0], [1], [0, 0, 1, 1], [], []>} : vector<256x128xf32>, vector<128x128xf32>, vector<256x128xf32> -> vector<256x128xf32>
    %c0_9 = arith.constant 0 : index
    %c0_10 = arith.constant 0 : index
    %11 = vector.load %arg5[%c0_9, %c0_10] : memref<1x128xf32, #tpu.memory_space<vmem>>, vector<1x128xf32>
    %12 = vector.broadcast %11 : vector<1x128xf32> to vector<256x128xf32>
    %13 = arith.addf %10, %12 : vector<256x128xf32>
    %c0_11 = arith.constant 0 : index
    %c0_12 = arith.constant 0 : index
    %14 = vector.load %arg6[%c0_11, %c0_12] : memref<256x128xf32, #tpu.memory_space<vmem>>, vector<256x128xf32>
    tpu.vector_store %arg6[%c0_11, %c0_12], %13 {strides = array<i32>} : memref<256x128xf32, #tpu.memory_space<vmem>>, vector<256x128xf32>,
    return
  }
  func.func @transform_0(%arg0: i32) -> (i32, i32) {
    %c0_i32 = arith.constant 0 : i32
    %c0_i32_0 = arith.constant 0 : i32
    return %arg0, %c0_i32 : i32, i32
  }
  func.func @transform_1(%arg0: i32) -> (i32, i32) {
    %c0_i32 = arith.constant 0 : i32
    %c0_i32_0 = arith.constant 0 : i32
    %c0_i32_1 = arith.constant 0 : i32
    return %c0_i32, %c0_i32_0 : i32, i32
  }
  func.func @transform_2(%arg0: i32) -> (i32, i32) {
    %c0_i32 = arith.constant 0 : i32
    %c0_i32_0 = arith.constant 0 : i32
    %c0_i32_1 = arith.constant 0 : i32
    return %c0_i32, %c0_i32_0 : i32, i32
  }
  func.func @transform_3(%arg0: i32) -> (i32, i32) {
    %c0_i32 = arith.constant 0 : i32
    %c0_i32_0 = arith.constant 0 : i32
    %c0_i32_1 = arith.constant 0 : i32
    return %c0_i32, %c0_i32_0 : i32, i32
  }
  func.func @transform_4(%arg0: i32) -> (i32, i32) {
    %c0_i32 = arith.constant 0 : i32
    %c0_i32_0 = arith.constant 0 : i32
    %c0_i32_1 = arith.constant 0 : i32
    return %c0_i32, %c0_i32_0 : i32, i32
  }
  func.func @transform_5(%arg0: i32) -> (i32, i32) {
    %c0_i32 = arith.constant 0 : i32
    %c0_i32_0 = arith.constant 0 : i32
    return %arg0, %c0_i32 : i32, i32
  }
}

</mosaic_0001>

<bundles_post_ra>
// kernel: _mlp_forward.1
= control target key start
LH: loop header
LB: loop body
LE: loop exit
PB: predicated region body
PF: predicated region fallthrough
CT: control target
= control target key end

     0   :  { %vm92_vm0 = vcmask 64512   ;;  %s1402_s1 = inlined_call_operand.vmem [shape: f32[8,128], index: 1, kind: input, shape index: {}]   ;;  %s1403_s0 = inlined_call_operand.vmem [shape: s32[256,8], index: 0, kind: input, shape index: {}]   ;;  %s1404_s3 = inlined_call_operand.vmem [shape: f32[128,128], index: 3, kind: input, shape index: {}]   ;;  %s1405_s2 = inlined_call_operand.vmem [shape: f32[1,128], index: 2, kind: input, shape index: {}]   ;;  %s1406_s4 = inlined_call_operand.vmem [shape: f32[1,128], index: 4, kind: input, shape index: {}]   ;;  %s1407_s5 = inlined_call_operand.vmem [shape: f32[256,128], index: 5, kind: output, shape index: {}]  }
   0x1   :  { %v84_v0 = vld [vmem:[%s1402_s1] sm:$0xff]  ;;  %v21_v2 = vld [vmem:[%s1403_s0 + $0x8] sm:$0xff]  ;;  %v22_v5 = vld [vmem:[%s1403_s0 + $0x10] sm:$0xff] }
   0x2   :  { %v20_v1 = vld [vmem:[%s1403_s0] sm:$0xff]  ;;  %845 = vmatprep.subr.mxu0 %v84_v0  ;;  %v53_v4 = vcvt.s32.f32 %v21_v2  ;;  %v23_v6 = vld [vmem:[%s1403_s0 + $0x18] sm:$0xff]  ;;  %v54_v7 = vcvt.s32.f32 %v22_v5  ;;  %v25_v11 = vld [vmem:[%s1403_s0 + $0x28] sm:$0xff] }
   0x3   :  { %v52_v3 = vcvt.s32.f32 %v20_v1  ;;  %846 = vmatpush3.msra.mxu0 %v84_v0  ;;  %v24_v8 = vld [vmem:[%s1403_s0 + $0x20] sm:$0xff]  ;;  %v55_v9 = vcvt.s32.f32 %v23_v6  ;;  %v26_v12 = vld [vmem:[%s1403_s0 + $0x30] sm:$0xff]  ;;  %v57_v13 = vcvt.s32.f32 %v25_v11  ;;  %v27_v15 = vld [vmem:[%s1403_s0 + $0x38] sm:$0xff] }
   0x4   :  { %v56_v10 = vcvt.s32.f32 %v24_v8  ;;  %v58_v14 = vcvt.s32.f32 %v26_v12  ;;  %v28_v16 = vld [vmem:[%s1403_s0 + $0x40] sm:$0xff]  ;;  %v447_v18 = vld [vmem:[%s1404_s3 + $0x8] sm:$0xff]  ;;  %v448_v19 = vld [vmem:[%s1404_s3 + $0x10] sm:$0xff]  ;;  %v59_v20 = vcvt.s32.f32 %v27_v15 }
   0x5   :  { %847 = vmatprep.mubr.msk.f32.mxu0 %vm92_vm0, %v52_v3  ;;  %v446_v17 = vld [vmem:[%s1404_s3] sm:$0xff]  ;;  %v449_v22 = vld [vmem:[%s1404_s3 + $0x18] sm:$0xff]  ;;  %v60_v23 = vcvt.s32.f32 %v28_v16  ;;  %v29_v24 = vld [vmem:[%s1403_s0 + $0x48] sm:$0xff] }
   0x6   :  { %848 = vmatmul.mubr.msk.f32.vlgmr.msra.gmra.mrb[0].mxu0 %vm92_vm0, %v53_v4  ;;  %v975_v21 = vpack.c.bf16 %v447_v18, %v446_v17  ;;  %v979_v25 = vpack.c.bf16 %v449_v22, %v448_v19  ;;  %v450_v26 = vld [vmem:[%s1404_s3 + $0x20] sm:$0xff]  ;;  %v451_v27 = vld [vmem:[%s1404_s3 + $0x28] sm:$0xff]  ;;  %v30_v28 = vld [vmem:[%s1403_s0 + $0x50] sm:$0xff]  ;;  %v61_v29 = vcvt.s32.f32 %v29_v24 }
   0x7   :  { %850 = vmatprep.mubr.msk.f32.mxu0 %vm92_vm0, %v54_v7  ;;  %v983_v30 = vpack.c.bf16 %v451_v27, %v450_v26  ;;  %v62_v31 = vcvt.s32.f32 %v30_v28  ;;  %v31_v32 = vld [vmem:[%s1403_s0 + $0x58] sm:$0xff]  ;;  %v452_v33 = vld [vmem:[%s1404_s3 + $0x30] sm:$0xff]  ;;  %v32_v35 = vld [vmem:[%s1403_s0 + $0x60] sm:$0xff] }
   0x8   :  { %976 = vmatprep.subr.bf16.mxu0 %v975_v21  ;;  %1007 = vmatprep.subr.bf16.mxu1 %v975_v21  ;;  %v453_v34 = vld [vmem:[%s1404_s3 + $0x38] sm:$0xff]  ;;  %v63_v36 = vcvt.s32.f32 %v31_v32  ;;  %v64_v38 = vcvt.s32.f32 %v32_v35  ;;  %v33_v39 = vld [vmem:[%s1403_s0 + $0x68] sm:$0xff]  ;;  %v454_v40 = vld [vmem:[%s1404_s3 + $0x40] sm:$0xff] }
   0x9   :  { %978 = vmatpush3.bf16.msra.mxu0 %v975_v21  ;;  %1015 = vmatpush3.bf16.msra.mxu1 %v975_v21  ;;  %v987_v37 = vpack.c.bf16 %v453_v34, %v452_v33  ;;  %v455_v41 = vld [vmem:[%s1404_s3 + $0x48] sm:$0xff]  ;;  %v34_v42 = vld [vmem:[%s1403_s0 + $0x70] sm:$0xff]  ;;  %v65_v43 = vcvt.s32.f32 %v33_v39  ;;  %v35_v46 = vld [vmem:[%s1403_s0 + $0x78] sm:$0xff] }
   0xa   :  { %851 = vmatmul.mubr.msk.f32.gmra.mrb[2].mxu0 %vm92_vm0, %v55_v9  ;;  %980 = vmatprep.subr.bf16.mxu0 %v979_v25  ;;  %v991_v44 = vpack.c.bf16 %v455_v41, %v454_v40  ;;  %v66_v45 = vcvt.s32.f32 %v34_v42  ;;  %v456_v47 = vld [vmem:[%s1404_s3 + $0x50] sm:$0xff]  ;;  %v457_v48 = vld [vmem:[%s1404_s3 + $0x58] sm:$0xff]  ;;  %v36_v49 = vld [vmem:[%s1403_s0 + $0x80] sm:$0xff]  ;;  %v67_v50 = vcvt.s32.f32 %v35_v46 }
   0xb   :  { %853 = vmatprep.mubr.msk.f32.mxu0 %vm92_vm0, %v56_v10  ;;  %1008 = vmatprep.subr.bf16.mxu1 %v979_v25  ;;  %v995_v51 = vpack.c.bf16 %v457_v48, %v456_v47  ;;  %v68_v52 = vcvt.s32.f32 %v36_v49  ;;  %v37_v53 = vld [vmem:[%s1403_s0 + $0x88] sm:$0xff]  ;;  %v458_v54 = vld [vmem:[%s1404_s3 + $0x60] sm:$0xff]  ;;  %v38_v56 = vld [vmem:[%s1403_s0 + $0x90] sm:$0xff] }
   0xc   :  { %v459_v55 = vld [vmem:[%s1404_s3 + $0x68] sm:$0xff]  ;;  %v69_v57 = vcvt.s32.f32 %v37_v53  ;;  %v70_v59 = vcvt.s32.f32 %v38_v56  ;;  %v39_v60 = vld [vmem:[%s1403_s0 + $0x98] sm:$0xff]  ;;  %v40_v61 = vld [vmem:[%s1403_s0 + $0xa0] sm:$0xff] }
   0xd   :  { %982 = vmatpush3.bf16.msra.mxu0 %v979_v25  ;;  %1016 = vmatpush3.bf16.msra.mxu1 %v979_v25  ;;  %v999_v58 = vpack.c.bf16 %v459_v55, %v458_v54  ;;  %v71_v62 = vcvt.s32.f32 %v39_v60  ;;  %v72_v63 = vcvt.s32.f32 %v40_v61  ;;  %v41_v0 = vld [vmem:[%s1403_s0 + $0xa8] sm:$0xff]  ;;  %v42_v1 = vld [vmem:[%s1403_s0 + $0xb0] sm:$0xff]  ;;  %v43_v4 = vld [vmem:[%s1403_s0 + $0xb8] sm:$0xff] }
   0xe   :  { %854 = vmatmul.mubr.msk.f32.gmra.mrb[4].mxu0 %vm92_vm0, %v57_v13  ;;  %984 = vmatprep.subr.bf16.mxu0 %v983_v30  ;;  %v73_v2 = vcvt.s32.f32 %v41_v0  ;;  %v74_v3 = vcvt.s32.f32 %v42_v1  ;;  %v44_v5 = vld [vmem:[%s1403_s0 + $0xc0] sm:$0xff]  ;;  %v75_v6 = vcvt.s32.f32 %v43_v4  ;;  %v45_v8 = vld [vmem:[%s1403_s0 + $0xc8] sm:$0xff]  ;;  %v46_v9 = vld [vmem:[%s1403_s0 + $0xd0] sm:$0xff] }
   0xf   :  { %856 = vmatprep.mubr.msk.f32.mxu0 %vm92_vm0, %v58_v14  ;;  %1009 = vmatprep.subr.bf16.mxu1 %v983_v30  ;;  %v76_v7 = vcvt.s32.f32 %v44_v5  ;;  %v77_v10 = vcvt.s32.f32 %v45_v8  ;;  %v78_v11 = vcvt.s32.f32 %v46_v9  ;;  %v47_v12 = vld [vmem:[%s1403_s0 + $0xd8] sm:$0xff]  ;;  %v48_v13 = vld [vmem:[%s1403_s0 + $0xe0] sm:$0xff]  ;;  %v49_v16 = vld [vmem:[%s1403_s0 + $0xe8] sm:$0xff] }
  0x10   :  { %v79_v14 = vcvt.s32.f32 %v47_v12  ;;  %v80_v15 = vcvt.s32.f32 %v48_v13  ;;  %v50_v17 = vld [vmem:[%s1403_s0 + $0xf0] sm:$0xff]  ;;  %v81_v18 = vcvt.s32.f32 %v49_v16  ;;  %v1235_v25 = vld [vmem:[%s1405_s2] ss:$0 sm:$0xff] }
  0x11   :  { %986 = vmatpush3.bf16.msra.mxu0 %v983_v30  ;;  %1017 = vmatpush3.bf16.msra.mxu1 %v983_v30  ;;  %v82_v19 = vcvt.s32.f32 %v50_v17  ;;  %v460_v22 = vld [vmem:[%s1404_s3 + $0x70] sm:$0xff] }
  0x12   :  { %857 = vmatmul.mubr.msk.f32.gmra.mrb[6].mxu0 %vm92_vm0, %v59_v20  ;;  %988 = vmatprep.subr.bf16.mxu0 %v987_v37  ;;  %v51_v20 = vld [vmem:[%s1403_s0 + $0xf8] sm:$0xff] }
  0x13   :  { %859 = vmatprep.mubr.msk.f32.mxu0 %vm92_vm0, %v60_v23  ;;  %1010 = vmatprep.subr.bf16.mxu1 %v987_v37  ;;  %v83_v21 = vcvt.s32.f32 %v51_v20  ;;  %v461_v23 = vld [vmem:[%s1404_s3 + $0x78] sm:$0xff] }
  0x14   :  { %v1003_v24 = vpack.c.bf16 %v461_v23, %v460_v22 }
  0x15   :  { %990 = vmatpush3.bf16.msra.mxu0 %v987_v37  ;;  %1018 = vmatpush3.bf16.msra.mxu1 %v987_v37 }
  0x16   :  { %860 = vmatmul.mubr.msk.f32.gmra.mrb[8].mxu0 %vm92_vm0, %v61_v29  ;;  %992 = vmatprep.subr.bf16.mxu0 %v991_v44 }
  0x17   :  { %862 = vmatprep.mubr.msk.f32.mxu0 %vm92_vm0, %v62_v31  ;;  %1011 = vmatprep.subr.bf16.mxu1 %v991_v44 }
  0x19   :  { %994 = vmatpush3.bf16.msra.mxu0 %v991_v44  ;;  %1019 = vmatpush3.bf16.msra.mxu1 %v991_v44 }
  0x1a   :  { %863 = vmatmul.mubr.msk.f32.gmra.mrb[10].mxu0 %vm92_vm0, %v63_v36  ;;  %996 = vmatprep.subr.bf16.mxu0 %v995_v51 }
  0x1b   :  { %865 = vmatprep.mubr.msk.f32.mxu0 %vm92_vm0, %v64_v38  ;;  %1012 = vmatprep.subr.bf16.mxu1 %v995_v51 }
  0x1d   :  { %998 = vmatpush3.bf16.msra.mxu0 %v995_v51  ;;  %1020 = vmatpush3.bf16.msra.mxu1 %v995_v51 }
  0x1e   :  { %866 = vmatmul.mubr.msk.f32.gmra.mrb[12].mxu0 %vm92_vm0, %v65_v43  ;;  %1000 = vmatprep.subr.bf16.mxu0 %v999_v58 }
  0x1f   :  { %868 = vmatprep.mubr.msk.f32.mxu0 %vm92_vm0, %v66_v45  ;;  %1013 = vmatprep.subr.bf16.mxu1 %v999_v58 }
  0x21   :  { %1002 = vmatpush3.bf16.msra.mxu0 %v999_v58  ;;  %1021 = vmatpush3.bf16.msra.mxu1 %v999_v58 }
  0x22   :  { %869 = vmatmul.mubr.msk.f32.gmra.mrb[14].mxu0 %vm92_vm0, %v67_v50  ;;  %1004 = vmatprep.subr.bf16.mxu0 %v1003_v24 }
  0x23   :  { %871 = vmatprep.mubr.msk.f32.mxu0 %vm92_vm0, %v68_v52  ;;  %1014 = vmatprep.subr.bf16.mxu1 %v1003_v24 }
  0x25   :  { %1006 = vmatpush3.bf16.msra.mxu0 %v1003_v24  ;;  %1022 = vmatpush3.bf16.msra.mxu1 %v1003_v24 }
  0x26   :  { %872 = vmatmul.mubr.msk.f32.gmra.mrb[16].mxu0 %vm92_vm0, %v69_v57 }
  0x27   :  { %874 = vmatprep.mubr.msk.f32.mxu0 %vm92_vm0, %v70_v59 }
  0x2a   :  { %875 = vmatmul.mubr.msk.f32.gmra.mrb[18].mxu0 %vm92_vm0, %v71_v62 }
  0x2b   :  { %877 = vmatprep.mubr.msk.f32.mxu0 %vm92_vm0, %v72_v63 }
  0x2e   :  { %878 = vmatmul.mubr.msk.f32.gmra.mrb[20].mxu0 %vm92_vm0, %v73_v2 }
  0x2f   :  { %880 = vmatprep.mubr.msk.f32.mxu0 %vm92_vm0, %v74_v3 }
  0x32   :  { %881 = vmatmul.mubr.msk.f32.gmra.mrb[22].mxu0 %vm92_vm0, %v75_v6 }
  0x33   :  { %883 = vmatprep.mubr.msk.f32.mxu0 %vm92_vm0, %v76_v7 }
  0x36   :  { %884 = vmatmul.mubr.msk.f32.gmra.mrb[24].mxu0 %vm92_vm0, %v77_v10 }
  0x37   :  { %886 = vmatprep.mubr.msk.f32.mxu0 %vm92_vm0, %v78_v11 }
  0x3a   :  { %887 = vmatmul.mubr.msk.f32.gmra.mrb[26].mxu0 %vm92_vm0, %v79_v14 }
  0x3b   :  { %889 = vmatprep.mubr.msk.f32.mxu0 %vm92_vm0, %v80_v15 }
  0x3e   :  { %890 = vmatmul.mubr.msk.f32.gmra.mrb[28].mxu0 %vm92_vm0, %v81_v18 }
  0x3f   :  { %892 = vmatprep.mubr.msk.f32.mxu0 %vm92_vm0, %v82_v19 }
  0x42   :  { %893 = vmatmul.mubr.msk.f32.gmra.mrb[30].mxu0 %vm92_vm0, %v83_v21 }
  0xd9   :  { %v849_v26 = vpop.f32.mrb[0].mxu0 }
  0xda   :  { %v261_v27 = vadd.f32 %v849_v26, %v1235_v25  ;;  %v255_v28 = vpop.f32.mrb[1].mxu0 }
  0xdb   :  { %v256_v29 = vadd.f32 %v1235_v25, %v255_v28 }
  0xdc   :  { %v415_v32 = vmax.f32 %v261_v27, 0.0 }
  0xdd   :  { %v414_v30 = vmax.f32 %v256_v29, 0.0  ;;  %v852_v31 = vpop.f32.mrb[2].mxu0 }
  0xde   :  { %v271_v33 = vadd.f32 %v852_v31, %v1235_v25  ;;  %v265_v34 = vpop.f32.mrb[3].mxu0 }
  0xdf   :  { %v266_v35 = vadd.f32 %v1235_v25, %v265_v34  ;;  %927 = vmatprep.mubr.f32.mxu0 %v414_v30 }
  0xe0   :  { %928 = vmatmul.mubr.f32.vlgmr.msra.gmra.mrb[32].mxu0 %v415_v32  ;;  %v417_v38 = vmax.f32 %v271_v33, 0.0 }
  0xe1   :  { %v416_v36 = vmax.f32 %v266_v35, 0.0  ;;  %v855_v37 = vpop.f32.mrb[4].mxu0 }
  0xe2   :  { %v281_v39 = vadd.f32 %v855_v37, %v1235_v25  ;;  %v275_v40 = vpop.f32.mrb[5].mxu0 }
  0xe3   :  { %v276_v41 = vadd.f32 %v1235_v25, %v275_v40  ;;  %930 = vmatprep.mubr.f32.mxu0 %v416_v36 }
  0xe4   :  { %931 = vmatmul.mubr.f32.gmra.mrb[34].mxu0 %v417_v38  ;;  %v419_v44 = vmax.f32 %v281_v39, 0.0 }
  0xe5   :  { %v418_v42 = vmax.f32 %v276_v41, 0.0  ;;  %v858_v43 = vpop.f32.mrb[6].mxu0 }
  0xe6   :  { %v291_v45 = vadd.f32 %v858_v43, %v1235_v25  ;;  %v285_v46 = vpop.f32.mrb[7].mxu0 }
  0xe7   :  { %933 = vmatprep.mubr.f32.mxu0 %v418_v42  ;;  %v286_v47 = vadd.f32 %v1235_v25, %v285_v46 }
  0xe8   :  { %934 = vmatmul.mubr.f32.gmra.mrb[36].mxu0 %v419_v44  ;;  %v421_v50 = vmax.f32 %v291_v45, 0.0 }
  0xe9   :  { %v861_v48 = vpop.f32.mrb[8].mxu0  ;;  %v420_v49 = vmax.f32 %v286_v47, 0.0 }
  0xea   :  { %v301_v51 = vadd.f32 %v861_v48, %v1235_v25  ;;  %v295_v52 = vpop.f32.mrb[9].mxu0 }
  0xeb   :  { %v296_v53 = vadd.f32 %v1235_v25, %v295_v52  ;;  %936 = vmatprep.mubr.f32.mxu1 %v420_v49 }
  0xec   :  { %937 = vmatmul.mubr.f32.vlgmr.msra.gmra.mrb[0].mxu1 %v421_v50  ;;  %v423_v56 = vmax.f32 %v301_v51, 0.0 }
  0xed   :  { %v422_v54 = vmax.f32 %v296_v53, 0.0  ;;  %v864_v55 = vpop.f32.mrb[10].mxu0 }
  0xee   :  { %v311_v57 = vadd.f32 %v864_v55, %v1235_v25  ;;  %v305_v58 = vpop.f32.mrb[11].mxu0 }
  0xef   :  { %v306_v59 = vadd.f32 %v1235_v25, %v305_v58  ;;  %939 = vmatprep.mubr.f32.mxu1 %v422_v54 }
  0xf0   :  { %940 = vmatmul.mubr.f32.gmra.mrb[2].mxu1 %v423_v56  ;;  %v425_v62 = vmax.f32 %v311_v57, 0.0 }
  0xf1   :  { %v424_v60 = vmax.f32 %v306_v59, 0.0  ;;  %v867_v61 = vpop.f32.mrb[12].mxu0  ;;  %v1272_v59 = vld [vmem:[%s1406_s4] ss:$0 sm:$0xff] }
  0xf2   :  { %v321_v63 = vadd.f32 %v867_v61, %v1235_v25  ;;  %v315_v0 = vpop.f32.mrb[13].mxu0 }
  0xf3   :  { %v316_v1 = vadd.f32 %v1235_v25, %v315_v0  ;;  %942 = vmatprep.mubr.f32.mxu1 %v424_v60 }
  0xf4   :  { %943 = vmatmul.mubr.f32.gmra.mrb[4].mxu1 %v425_v62  ;;  %v427_v4 = vmax.f32 %v321_v63, 0.0 }
  0xf5   :  { %v426_v2 = vmax.f32 %v316_v1, 0.0  ;;  %v870_v3 = vpop.f32.mrb[14].mxu0 }
  0xf6   :  { %v331_v5 = vadd.f32 %v870_v3, %v1235_v25  ;;  %v325_v6 = vpop.f32.mrb[15].mxu0 }
  0xf7   :  { %v326_v7 = vadd.f32 %v1235_v25, %v325_v6  ;;  %945 = vmatprep.mubr.f32.mxu1 %v426_v2 }
  0xf8   :  { %946 = vmatmul.mubr.f32.gmra.mrb[6].mxu1 %v427_v4  ;;  %v429_v10 = vmax.f32 %v331_v5, 0.0 }
  0xf9   :  { %v428_v8 = vmax.f32 %v326_v7, 0.0  ;;  %v873_v9 = vpop.f32.mrb[16].mxu0 }
  0xfa   :  { %v341_v11 = vadd.f32 %v873_v9, %v1235_v25  ;;  %v335_v12 = vpop.f32.mrb[17].mxu0 }
  0xfb   :  { %v336_v13 = vadd.f32 %v1235_v25, %v335_v12  ;;  %948 = vmatprep.mubr.f32.mxu1 %v428_v8 }
  0xfc   :  { %949 = vmatmul.mubr.f32.gmra.mrb[8].mxu1 %v429_v10  ;;  %v431_v16 = vmax.f32 %v341_v11, 0.0 }
  0xfd   :  { %v430_v14 = vmax.f32 %v336_v13, 0.0  ;;  %v876_v15 = vpop.f32.mrb[18].mxu0 }
  0xfe   :  { %v351_v17 = vadd.f32 %v876_v15, %v1235_v25  ;;  %v345_v18 = vpop.f32.mrb[19].mxu0 }
  0xff   :  { %v346_v19 = vadd.f32 %v1235_v25, %v345_v18  ;;  %951 = vmatprep.mubr.f32.mxu1 %v430_v14 }
 0x100   :  { %952 = vmatmul.mubr.f32.gmra.mrb[10].mxu1 %v431_v16  ;;  %v433_v22 = vmax.f32 %v351_v17, 0.0 }
 0x101   :  { %v432_v20 = vmax.f32 %v346_v19, 0.0  ;;  %v879_v21 = vpop.f32.mrb[20].mxu0 }
 0x102   :  { %v361_v23 = vadd.f32 %v879_v21, %v1235_v25  ;;  %v355_v24 = vpop.f32.mrb[21].mxu0 }
 0x103   :  { %v356_v26 = vadd.f32 %v1235_v25, %v355_v24  ;;  %954 = vmatprep.mubr.f32.mxu1 %v432_v20 }
 0x104   :  { %955 = vmatmul.mubr.f32.gmra.mrb[12].mxu1 %v433_v22  ;;  %v435_v29 = vmax.f32 %v361_v23, 0.0 }
 0x105   :  { %v434_v27 = vmax.f32 %v356_v26, 0.0  ;;  %v882_v28 = vpop.f32.mrb[22].mxu0 }
 0x106   :  { %v371_v30 = vadd.f32 %v882_v28, %v1235_v25  ;;  %v365_v31 = vpop.f32.mrb[23].mxu0 }
 0x107   :  { %v366_v32 = vadd.f32 %v1235_v25, %v365_v31  ;;  %957 = vmatprep.mubr.f32.mxu1 %v434_v27 }
 0x108   :  { %958 = vmatmul.mubr.f32.gmra.mrb[14].mxu1 %v435_v29  ;;  %v437_v35 = vmax.f32 %v371_v30, 0.0 }
 0x109   :  { %v436_v33 = vmax.f32 %v366_v32, 0.0  ;;  %v885_v34 = vpop.f32.mrb[24].mxu0 }
 0x10a   :  { %v381_v36 = vadd.f32 %v885_v34, %v1235_v25  ;;  %v375_v37 = vpop.f32.mrb[25].mxu0 }
 0x10b   :  { %v376_v38 = vadd.f32 %v1235_v25, %v375_v37  ;;  %960 = vmatprep.mubr.f32.mxu1 %v436_v33 }
 0x10c   :  { %961 = vmatmul.mubr.f32.gmra.mrb[16].mxu1 %v437_v35  ;;  %v439_v41 = vmax.f32 %v381_v36, 0.0 }
 0x10d   :  { %v438_v39 = vmax.f32 %v376_v38, 0.0  ;;  %v888_v40 = vpop.f32.mrb[26].mxu0 }
 0x10e   :  { %v391_v42 = vadd.f32 %v888_v40, %v1235_v25  ;;  %v385_v43 = vpop.f32.mrb[27].mxu0 }
 0x10f   :  { %v386_v44 = vadd.f32 %v1235_v25, %v385_v43  ;;  %963 = vmatprep.mubr.f32.mxu1 %v438_v39 }
 0x110   :  { %964 = vmatmul.mubr.f32.gmra.mrb[18].mxu1 %v439_v41  ;;  %v441_v47 = vmax.f32 %v391_v42, 0.0 }
 0x111   :  { %v440_v45 = vmax.f32 %v386_v44, 0.0  ;;  %v891_v46 = vpop.f32.mrb[28].mxu0 }
 0x112   :  { %v401_v48 = vadd.f32 %v891_v46, %v1235_v25  ;;  %v395_v49 = vpop.f32.mrb[29].mxu0 }
 0x113   :  { %v396_v50 = vadd.f32 %v1235_v25, %v395_v49  ;;  %966 = vmatprep.mubr.f32.mxu1 %v440_v45 }
 0x114   :  { %967 = vmatmul.mubr.f32.gmra.mrb[20].mxu1 %v441_v47  ;;  %v443_v53 = vmax.f32 %v401_v48, 0.0 }
 0x115   :  { %v442_v51 = vmax.f32 %v396_v50, 0.0  ;;  %v894_v52 = vpop.f32.mrb[30].mxu0 }
 0x116   :  { %v411_v54 = vadd.f32 %v894_v52, %v1235_v25  ;;  %v405_v55 = vpop.f32.mrb[31].mxu0 }
 0x117   :  { %v406_v56 = vadd.f32 %v1235_v25, %v405_v55  ;;  %969 = vmatprep.mubr.f32.mxu1 %v442_v51 }
 0x118   :  { %970 = vmatmul.mubr.f32.gmra.mrb[22].mxu1 %v443_v53  ;;  %v445_v58 = vmax.f32 %v411_v54, 0.0 }
 0x119   :  { %v444_v57 = vmax.f32 %v406_v56, 0.0 }
 0x11b   :  { %972 = vmatprep.mubr.f32.mxu1 %v444_v57 }
 0x11c   :  { %973 = vmatmul.mubr.f32.gmra.mrb[24].mxu1 %v445_v58 }
 0x1b3   :  { %v929_v60 = vpop.f32.mrb[32].mxu0 }
 0x1b4   :  { %v541_v61 = vadd.f32 %v929_v60, %v1272_v59  ;;  %v535_v62 = vpop.f32.mrb[33].mxu0 }
 0x1b5   :  { %v536_v63 = vadd.f32 %v1272_v59, %v535_v62 }
 0x1b6   :  { %695 = vst [vmem:[%s1407_s5 + $0x8] sm:$0xff] %v541_v61 }
 0x1b7   :  { %694 = vst [vmem:[%s1407_s5] sm:$0xff] %v536_v63  ;;  %v932_v25 = vpop.f32.mrb[34].mxu0 }
 0x1b8   :  { %v551_v0 = vadd.f32 %v932_v25, %v1272_v59  ;;  %v545_v1 = vpop.f32.mrb[35].mxu0 }
 0x1b9   :  { %v546_v2 = vadd.f32 %v1272_v59, %v545_v1 }
 0x1ba   :  { %697 = vst [vmem:[%s1407_s5 + $0x18] sm:$0xff] %v551_v0 }
 0x1bb   :  { %696 = vst [vmem:[%s1407_s5 + $0x10] sm:$0xff] %v546_v2  ;;  %v935_v3 = vpop.f32.mrb[36].mxu0 }
 0x1bc   :  { %v561_v4 = vadd.f32 %v935_v3, %v1272_v59  ;;  %v555_v5 = vpop.f32.mrb[37].mxu0 }
 0x1bd   :  { %v556_v6 = vadd.f32 %v1272_v59, %v555_v5 }
 0x1be   :  { %699 = vst [vmem:[%s1407_s5 + $0x28] sm:$0xff] %v561_v4 }
 0x1bf   :  { %698 = vst [vmem:[%s1407_s5 + $0x20] sm:$0xff] %v556_v6  ;;  %v938_v7 = vpop.f32.mrb[0].mxu1 }
 0x1c0   :  { %v571_v8 = vadd.f32 %v938_v7, %v1272_v59  ;;  %v565_v9 = vpop.f32.mrb[1].mxu1 }
 0x1c1   :  { %v566_v10 = vadd.f32 %v1272_v59, %v565_v9 }
 0x1c2   :  { %701 = vst [vmem:[%s1407_s5 + $0x38] sm:$0xff] %v571_v8 }
 0x1c3   :  { %700 = vst [vmem:[%s1407_s5 + $0x30] sm:$0xff] %v566_v10  ;;  %v941_v11 = vpop.f32.mrb[2].mxu1 }
 0x1c4   :  { %v581_v12 = vadd.f32 %v941_v11, %v1272_v59  ;;  %v575_v13 = vpop.f32.mrb[3].mxu1 }
 0x1c5   :  { %v576_v14 = vadd.f32 %v1272_v59, %v575_v13 }
 0x1c6   :  { %703 = vst [vmem:[%s1407_s5 + $0x48] sm:$0xff] %v581_v12 }
 0x1c7   :  { %702 = vst [vmem:[%s1407_s5 + $0x40] sm:$0xff] %v576_v14  ;;  %v944_v15 = vpop.f32.mrb[4].mxu1 }
 0x1c8   :  { %v591_v16 = vadd.f32 %v944_v15, %v1272_v59  ;;  %v585_v17 = vpop.f32.mrb[5].mxu1 }
 0x1c9   :  { %v586_v18 = vadd.f32 %v1272_v59, %v585_v17 }
 0x1ca   :  { %705 = vst [vmem:[%s1407_s5 + $0x58] sm:$0xff] %v591_v16 }
 0x1cb   :  { %704 = vst [vmem:[%s1407_s5 + $0x50] sm:$0xff] %v586_v18  ;;  %v947_v19 = vpop.f32.mrb[6].mxu1 }
 0x1cc   :  { %v601_v20 = vadd.f32 %v947_v19, %v1272_v59  ;;  %v595_v21 = vpop.f32.mrb[7].mxu1 }
 0x1cd   :  { %v596_v22 = vadd.f32 %v1272_v59, %v595_v21 }
 0x1ce   :  { %707 = vst [vmem:[%s1407_s5 + $0x68] sm:$0xff] %v601_v20 }
 0x1cf   :  { %706 = vst [vmem:[%s1407_s5 + $0x60] sm:$0xff] %v596_v22  ;;  %v950_v23 = vpop.f32.mrb[8].mxu1 }
 0x1d0   :  { %v611_v24 = vadd.f32 %v950_v23, %v1272_v59  ;;  %v605_v26 = vpop.f32.mrb[9].mxu1 }
 0x1d1   :  { %v606_v27 = vadd.f32 %v1272_v59, %v605_v26 }
 0x1d2   :  { %709 = vst [vmem:[%s1407_s5 + $0x78] sm:$0xff] %v611_v24 }
 0x1d3   :  { %708 = vst [vmem:[%s1407_s5 + $0x70] sm:$0xff] %v606_v27  ;;  %v953_v28 = vpop.f32.mrb[10].mxu1 }
 0x1d4   :  { %v621_v29 = vadd.f32 %v953_v28, %v1272_v59  ;;  %v615_v30 = vpop.f32.mrb[11].mxu1 }
 0x1d5   :  { %v616_v31 = vadd.f32 %v1272_v59, %v615_v30 }
 0x1d6   :  { %711 = vst [vmem:[%s1407_s5 + $0x88] sm:$0xff] %v621_v29 }
 0x1d7   :  { %710 = vst [vmem:[%s1407_s5 + $0x80] sm:$0xff] %v616_v31  ;;  %v956_v32 = vpop.f32.mrb[12].mxu1 }
 0x1d8   :  { %v631_v33 = vadd.f32 %v956_v32, %v1272_v59  ;;  %v625_v34 = vpop.f32.mrb[13].mxu1 }
 0x1d9   :  { %v626_v35 = vadd.f32 %v1272_v59, %v625_v34 }
 0x1da   :  { %713 = vst [vmem:[%s1407_s5 + $0x98] sm:$0xff] %v631_v33 }
 0x1db   :  { %712 = vst [vmem:[%s1407_s5 + $0x90] sm:$0xff] %v626_v35  ;;  %v959_v36 = vpop.f32.mrb[14].mxu1 }
 0x1dc   :  { %v641_v37 = vadd.f32 %v959_v36, %v1272_v59  ;;  %v635_v38 = vpop.f32.mrb[15].mxu1 }
 0x1dd   :  { %v636_v39 = vadd.f32 %v1272_v59, %v635_v38 }
 0x1de   :  { %715 = vst [vmem:[%s1407_s5 + $0xa8] sm:$0xff] %v641_v37 }
 0x1df   :  { %714 = vst [vmem:[%s1407_s5 + $0xa0] sm:$0xff] %v636_v39  ;;  %v962_v40 = vpop.f32.mrb[16].mxu1 }
 0x1e0   :  { %v651_v41 = vadd.f32 %v962_v40, %v1272_v59  ;;  %v645_v42 = vpop.f32.mrb[17].mxu1 }
 0x1e1   :  { %v646_v43 = vadd.f32 %v1272_v59, %v645_v42 }
 0x1e2   :  { %717 = vst [vmem:[%s1407_s5 + $0xb8] sm:$0xff] %v651_v41 }
 0x1e3   :  { %716 = vst [vmem:[%s1407_s5 + $0xb0] sm:$0xff] %v646_v43  ;;  %v965_v44 = vpop.f32.mrb[18].mxu1 }
 0x1e4   :  { %v661_v45 = vadd.f32 %v965_v44, %v1272_v59  ;;  %v655_v46 = vpop.f32.mrb[19].mxu1 }
 0x1e5   :  { %v656_v47 = vadd.f32 %v1272_v59, %v655_v46 }
 0x1e6   :  { %719 = vst [vmem:[%s1407_s5 + $0xc8] sm:$0xff] %v661_v45 }
 0x1e7   :  { %718 = vst [vmem:[%s1407_s5 + $0xc0] sm:$0xff] %v656_v47  ;;  %v968_v48 = vpop.f32.mrb[20].mxu1 }
 0x1e8   :  { %v671_v49 = vadd.f32 %v968_v48, %v1272_v59  ;;  %v665_v50 = vpop.f32.mrb[21].mxu1 }
 0x1e9   :  { %v666_v51 = vadd.f32 %v1272_v59, %v665_v50 }
 0x1ea   :  { %721 = vst [vmem:[%s1407_s5 + $0xd8] sm:$0xff] %v671_v49 }
 0x1eb   :  { %720 = vst [vmem:[%s1407_s5 + $0xd0] sm:$0xff] %v666_v51  ;;  %v971_v52 = vpop.f32.mrb[22].mxu1 }
 0x1ec   :  { %v681_v53 = vadd.f32 %v971_v52, %v1272_v59  ;;  %v675_v54 = vpop.f32.mrb[23].mxu1 }
 0x1ed   :  { %v676_v55 = vadd.f32 %v1272_v59, %v675_v54 }
 0x1ee   :  { %723 = vst [vmem:[%s1407_s5 + $0xe8] sm:$0xff] %v681_v53 }
 0x1ef   :  { %722 = vst [vmem:[%s1407_s5 + $0xe0] sm:$0xff] %v676_v55  ;;  %v974_v56 = vpop.f32.mrb[24].mxu1 }
 0x1f0   :  { %v691_v57 = vadd.f32 %v974_v56, %v1272_v59  ;;  %v685_v58 = vpop.f32.mrb[25].mxu1 }
 0x1f1   :  { %v686_v60 = vadd.f32 %v1272_v59, %v685_v58 }
 0x1f2   :  { %725 = vst [vmem:[%s1407_s5 + $0xf8] sm:$0xff] %v691_v57 }
 0x1f3   :  { %724 = vst [vmem:[%s1407_s5 + $0xf0] sm:$0xff] %v686_v60 }

</bundles_post_ra>
